<compile_context>
chip_gen: v6e
topology: v6e:2x2x1
jax: 0.10.0
libtpu: 0.0.40
codegen_flags: <defaults>
</compile_context>

<pallas_src>
import jax
import jax.numpy as jnp
from jax.experimental import pallas as pl
from jax.experimental.pallas import tpu as pltpu

# ---------------------------------------------------------------------------
# Tiling constants
# ---------------------------------------------------------------------------
_MAX_LANE = 2048                 # cap on lane-dense last dim (multiple of 128)
_TARGET_BLOCK_BYTES = 8 << 20    # ~8 MiB/block: per-grid-step overhead ~6% on v7x
_VMEM_LIMIT_BYTES = 48 << 20     # 2 bufs x (in + out) x 8 MiB = 32 MiB resident
_MIN_PALLAS_ELEMS = 1 << 15      # below this, XLA's fused op wins (fixed overhead)


def _swish_kernel(x_ref, o_ref):
    # swish(x) = x * sigmoid(x) = 0.5 * x * (1 + tanh(x/2))
    #  -> exactly one transcendental per element (tanh rides the EUP slot);
    #     the extra mul/adds go to the 4-wide VALU, which has slack in a
    #     memory-bound kernel.  Compute in f32 (free for f32 inputs, cheap
    #     casts for bf16) and cast back on store.
    x = x_ref[...].astype(jnp.float32)
    y = 0.5 * x * (1.0 + jnp.tanh(0.5 * x))
    o_ref[...] = y.astype(o_ref.dtype)


def _pick_lane(total):
    """Largest multiple of 128 that divides `total` (capped); 0 if none."""
    start = min(_MAX_LANE, (total // 128) * 128)
    for lane in range(start, 0, -128):
        if total % lane == 0:
            return lane
    return 0


def _pick_tile_rows(rows, lane, itemsize):
    """Row tile: ~_TARGET_BLOCK_BYTES, multiple of the sublane quantum, and
    dividing `rows` when possible (avoids a masked ragged last block)."""
    sublane = {4: 8, 2: 16, 1: 32}.get(itemsize, 8)
    if rows <= sublane:
        return rows                               # full-extent block: always legal
    target = max(sublane, _TARGET_BLOCK_BYTES // (lane * itemsize))
    target = (target // sublane) * sublane
    tile_r = min(rows, target)
    if rows % tile_r == 0:
        return tile_r
    # Prefer a divisor of rows (no ragged last block), largest <= target.
    for cand in range(tile_r, sublane - 1, -sublane):
        if rows % cand == 0:
            return cand
    return tile_r                                 # ragged last block: correct, minor cost


def _swish_pallas(x):
    orig_shape, orig_dtype = x.shape, x.dtype
    total = x.size
    itemsize = jnp.dtype(orig_dtype).itemsize

    lane = _pick_lane(total)
    assert lane > 0, "caller must guarantee total % 128 == 0"

    rows = total // lane
    x2 = x.reshape(rows, lane)                    # pure reshape: no pad, no extra HBM copy
    tile_r = _pick_tile_rows(rows, lane, itemsize)

    out = pl.pallas_call(
        _swish_kernel,
        out_shape=jax.ShapeDtypeStruct((rows, lane), orig_dtype),
        grid=(pl.cdiv(rows, tile_r),),
        in_specs=[pl.BlockSpec((tile_r, lane), lambda i: (i, 0))],
        out_specs=pl.BlockSpec((tile_r, lane), lambda i: (i, 0)),
        compiler_params=pltpu.CompilerParams(
            # "parallel" lets Mosaic shard the row axis across TensorCores
            # where supported.
            # TODO(synk): on v7x verify both TCs are used; if plain "parallel"
            # runs on a single TC, switch this axis to pltpu.CORE_PARALLEL.
            dimension_semantics=("parallel",),
            vmem_limit_bytes=_VMEM_LIMIT_BYTES,
        ),
    )(x2)
    return out.reshape(orig_shape)


@jax.jit
def swish(x):
    """Elementwise swish: x * sigmoid(x). Matches PyTorch Swish.forward.

    Note: PyTorch's in-place variant mutates x; JAX is functional, so a new
    array is returned (same values).
    """
    total = x.size
    if total == 0:
        return x
    if total % 128 != 0 or total < _MIN_PALLAS_ELEMS:
        # Tiny or lane-misaligned tensors: XLA's fused elementwise op is as
        # fast or faster than a pallas_call plus pad/un-pad HBM copies.
        return x * jax.nn.sigmoid(x)
    return _swish_pallas(x)


if __name__ == "__main__":
    key = jax.random.PRNGKey(0)
    k1, k2 = jax.random.split(key)

    # Small NCHW activation consistent with the module: [N=2, C=4, H=16, W=16].
    x_small = jax.random.normal(k1, (2, 4, 16, 16), dtype=jnp.float32)
    # Larger lane-aligned activation that takes the Pallas path via dispatch.
    x_big = jax.random.normal(k2, (8, 32, 32, 32), dtype=jnp.float32)

    # Exercise the Pallas kernel directly on the small demo tensor (bypassing
    # the tiny-input short circuit), plus the public dispatcher on both shapes.
    y_small_kernel = _swish_pallas(x_small)
    y_small = swish(x_small)
    y_big = swish(x_big)                          # Pallas path
    jax.block_until_ready((y_small_kernel, y_small, y_big))

    def ref(v):
        return v * jax.nn.sigmoid(v)

    for y, x in ((y_small_kernel, x_small), (y_small, x_small), (y_big, x_big)):
        assert y.shape == x.shape and y.dtype == x.dtype
        assert float(jnp.max(jnp.abs(y - ref(x)))) < 1e-5

    print("KERNEL_OK")
</pallas_src>

<mosaic_0001>
module attributes {stable_mosaic.version = 11 : i64} {
  func.func @_swish_kernel(%arg0: i32, %arg1: memref<1x2048xf32, #tpu.memory_space<vmem>>, %arg2: memref<1x2048xf32, #tpu.memory_space<vmem>>) attributes {dimension_semantics = [#tpu.dimension_semantics<parallel>], iteration_bounds = array<i64: 1>, scalar_prefetch = 0 : i64, scratch_operands = 0 : i64, tpu.core_type = #tpu.core_type<tc>, window_params = [{transform_indices = @transform_0, window_bounds = array<i64: 1, 2048>}, {transform_indices = @transform_1, window_bounds = array<i64: 1, 2048>}]} {
    %c0 = arith.constant 0 : index
    %c0_0 = arith.constant 0 : index
    %0 = vector.load %arg1[%c0, %c0_0] : memref<1x2048xf32, #tpu.memory_space<vmem>>, vector<1x2048xf32>
    %cst = arith.constant 5.000000e-01 : f32
    %1 = vector.broadcast %cst : f32 to vector<1x2048xf32>
    %2 = arith.mulf %1, %0 : vector<1x2048xf32>
    %cst_1 = arith.constant 5.000000e-01 : f32
    %3 = vector.broadcast %cst_1 : f32 to vector<1x2048xf32>
    %4 = arith.mulf %3, %0 : vector<1x2048xf32>
    %5 = math.tanh %4 : vector<1x2048xf32>
    %cst_2 = arith.constant 1.000000e+00 : f32
    %6 = vector.broadcast %cst_2 : f32 to vector<1x2048xf32>
    %7 = arith.addf %6, %5 : vector<1x2048xf32>
    %8 = arith.mulf %2, %7 : vector<1x2048xf32>
    %c0_3 = arith.constant 0 : index
    %c0_4 = arith.constant 0 : index
    %9 = vector.load %arg2[%c0_3, %c0_4] : memref<1x2048xf32, #tpu.memory_space<vmem>>, vector<1x2048xf32>
    tpu.vector_store %arg2[%c0_3, %c0_4], %8 {strides = array<i32>} : memref<1x2048xf32, #tpu.memory_space<vmem>>, vector<1x2048xf32>,
    return
  }
  func.func @transform_0(%arg0: i32) -> (i32, i32) {
    %c0_i32 = arith.constant 0 : i32
    %c0_i32_0 = arith.constant 0 : i32
    return %arg0, %c0_i32 : i32, i32
  }
  func.func @transform_1(%arg0: i32) -> (i32, i32) {
    %c0_i32 = arith.constant 0 : i32
    %c0_i32_0 = arith.constant 0 : i32
    return %arg0, %c0_i32 : i32, i32
  }
}

</mosaic_0001>

<bundles_post_ra>
// kernel: tpu_custom_call.1
= control target key start
LH: loop header
LB: loop body
LE: loop exit
PB: predicated region body
PF: predicated region fallthrough
CT: control target
= control target key end

     0   :  { %6 = vsyncpa [#allocation3], 0  ;;  %s116_s0 = inlined_call_operand.hbm [shape: f32[1,2048], index: 0, kind: input, shape index: {}]   ;;  %s117_s1 = inlined_call_operand.hbm [shape: f32[1,2048], index: 1, kind: output, shape index: {}]  }
   0x1   :  { %7 = vsyncpa [#allocation4], 0  ;;  %s98_s6 = smov [#allocation2]  }
   0x2   :  { %s14_s7 = sshll.u32 %s98_s6, 4  ;;  %s15_s7 = int_to_ptr.vmem [resolvable:$true] %s14_s7 }
   0x3   :  { %s62_s8 = scalar_lea.vmem %s15_s7, 256  ;;  %p67_p1 = scmp.lt.s32.totalorder %s15_s7, %s15_s7 }
   0x4   :  { %p63_p0 = scmp.ne.s32.totalorder %s15_s7, %s62_s8  ;;  %p68_p2 = scmp.lt.s32.totalorder %s62_s8, %s62_s8 }
   0x6   :  { %p69_p3 = por %p68_p2, %p67_p1 }
   0x8   :  { %p70_p4 = pnand %p69_p3, %p63_p0 }
   0xa   :  { %73 = shalt.err (!%p70_p4)
}
   0xb   :  { %17 = dma.hbm_to_vmem [thread:$0]  %s116_s0, 256, %s15_s7, [#allocation3]  }
   0xc   :  { %94 = dma.done.wait [#allocation3], 256  }
   0xd   :  { %95 = vsyncadd [#allocation3], 4294967040  ;;  %v21_v0 = vld [vmem:[#allocation2] sm:$0xff]  ;;  %v22_v1 = vld [vmem:[#allocation2 + $0x8] sm:$0xff]  ;;  %s99_s11 = smov [#allocation5]  }
   0xe   :  { %v23_v2 = vmul.f32 0.5, %v21_v0  ;;  %v24_v3 = vmul.f32 0.5, %v22_v1  ;;  %s39_s12 = sshll.u32 %s99_s11, 4  ;;  %s40_s12 = int_to_ptr.vmem [resolvable:$true] %s39_s12 }
   0xf   :  { %s74_s0 = scalar_lea.vmem %s40_s12, 256  ;;  %p79_p6 = scmp.lt.s32.totalorder %s40_s12, %s40_s12 }
  0x10   :  { %50 = vtanh.f32 %v23_v2  ;;  %p75_p5 = scmp.ne.s32.totalorder %s40_s12, %s74_s0  ;;  %p80_p7 = scmp.lt.s32.totalorder %s74_s0, %s74_s0 }
  0x11   :  { %52 = vtanh.f32 %v24_v3 }
  0x12   :  { %p81_p8 = por %p80_p7, %p79_p6 }
  0x14   :  { %p82_p9 = pnand %p81_p8, %p75_p5 }
  0x1d   :  { %v51_v4 = vpop.eup %50 }
  0x1e   :  { %v53_v5 = vpop.eup %52  ;;  %v27_v6 = vadd.f32 1.0, %v51_v4 }
  0x1f   :  { %v28_v7 = vadd.f32 1.0, %v53_v5 }
  0x20   :  { %v29_v8 = vmul.f32 %v27_v6, %v23_v2 }
  0x21   :  { %v30_v9 = vmul.f32 %v28_v7, %v24_v3 }
  0x22   :  { %31 = vst [vmem:[#allocation5] sm:$0xff] %v29_v8 }
  0x23   :  { %32 = vst [vmem:[#allocation5 + $0x8] sm:$0xff] %v30_v9 }
  0x24   :  { %85 = shalt.err (!%p82_p9)
}
  0x25   :  { %42 = dma.vmem_to_hbm [thread:$0]  %s40_s12, 256, %s117_s1, [#allocation4]  }
  0x26   :  { %96 = dma.done.wait [#allocation4], 256  }
  0x27   :  { %97 = vsyncadd [#allocation4], 4294967040 }
  0x28   :  { %46 = vsyncpa [#allocation3], 1 }
  0x29   :  { %47 = vsyncpa [#allocation4], 1 }

</bundles_post_ra>
